<compile_context>
chip_gen: v7x
topology: tpu7x:2x2x1
jax: 0.10.0
libtpu: 0.0.40
codegen_flags: <defaults>
</compile_context>

<pallas_src>
import functools

import jax
import jax.numpy as jnp
from jax import lax
from jax.experimental import pallas as pl
from jax.experimental.pallas import tpu as pltpu


def _round_up(n, m):
    return ((n + m - 1) // m) * m


def _spade_kernel(x_ref, p1_ref, w1_ref, b1_ref, w2_ref, b2_ref, out_ref, *,
                  C_IN, NH_P, W, L, PAD, eps, compute_dtype):
    # ---- InstanceNorm2d (affine=False): keep only mean & inv-std, not the full
    #      normalized tensor, so vreg/VMEM pressure stays low through the convs ----
    x = x_ref[0].astype(jnp.float32)                         # (C_IN, L)
    mean = jnp.mean(x, axis=1, keepdims=True)                # (C_IN, 1)
    var = jnp.mean((x - mean) ** 2, axis=1, keepdims=True)   # biased variance
    inv = lax.rsqrt(var + eps)                               # (C_IN, 1)

    # ---- mlp_shared: ONE im2col matmul (K = 9*C_SEG), bias + ReLU in f32 ----
    actv = jnp.dot(w1_ref[...], p1_ref[0],
                   preferred_element_type=jnp.float32)       # (NH_P, L)
    actv = jnp.maximum(actv + b1_ref[...], 0.0)

    # ---- conv2 im2col: lane shifts of actv.  Zero extension along lanes handles
    #      the top/bottom (H) halo; explicit masks handle the left/right (W) wrap. ----
    zpad = jnp.zeros((NH_P, PAD), jnp.float32)
    ext = jnp.concatenate([zpad, actv, zpad], axis=1)        # (NH_P, L + 2*PAD)
    wcol = lax.broadcasted_iota(jnp.int32, (1, L), 1) % W
    left_ok = wcol >= 1          # sampling column w-1 is valid
    right_ok = wcol <= W - 2     # sampling column w+1 is valid

    pieces = []
    for ky in range(3):
        for kx in range(3):
            off = (ky - 1) * W + (kx - 1)
            sl = lax.slice(ext, (0, PAD + off), (NH_P, PAD + off + L))
            if kx == 0:
                sl = jnp.where(left_ok, sl, 0.0)
            elif kx == 2:
                sl = jnp.where(right_ok, sl, 0.0)
            pieces.append(sl)
    patches2 = jnp.concatenate(pieces, axis=0)               # (9*NH_P, L)

    # ---- fused mlp_gamma + mlp_beta: ONE matmul, N = 2*C_IN, K = 9*NH_P ----
    gb = jnp.dot(w2_ref[...], patches2.astype(compute_dtype),
                 preferred_element_type=jnp.float32) + b2_ref[...]   # (2*C_IN, L)
    gamma = gb[:C_IN, :]
    beta = gb[C_IN:2 * C_IN, :]

    out = (x - mean) * (inv * (1.0 + gamma)) + beta
    out_ref[0] = out.astype(out_ref.dtype)


def _nearest_resize_nchw(segmap, H, W):
    # PyTorch F.interpolate(mode='nearest'): src = floor(dst * in/out)
    Hs, Ws = segmap.shape[2], segmap.shape[3]
    ih = (jnp.arange(H) * Hs) // H
    iw = (jnp.arange(W) * Ws) // W
    return segmap[:, :, ih, :][:, :, :, iw]


def _im2col_3x3(x_nchw):
    """(B, C, H, W) -> (B, 9*C, H*W) patches for a 3x3 / pad=1 conv (tap-major)."""
    B, C, H, W = x_nchw.shape
    xp = jnp.pad(x_nchw, ((0, 0), (0, 0), (1, 1), (1, 1)))
    taps = [xp[:, :, ky:ky + H, kx:kx + W] for ky in range(3) for kx in range(3)]
    return jnp.stack(taps, axis=1).reshape(B, 9 * C, H * W)


def _pack_params(params, compute_dtype):
    """Flatten conv weights to matmul form; fuse gamma/beta; pad nhidden to 8."""
    w_sh = params["w_shared"]                                # (NH, C_SEG, 3, 3) OIHW
    NH, C_SEG = w_sh.shape[0], w_sh.shape[1]
    C_IN = params["w_gamma"].shape[0]
    NH_P = _round_up(NH, 8)

    # conv1 weight: [o, (ky, kx, c)] matches wrapper im2col ordering.
    w1 = w_sh.transpose(0, 2, 3, 1).reshape(NH, 9 * C_SEG)
    w1 = jnp.zeros((NH_P, 9 * C_SEG), w1.dtype).at[:NH].set(w1)
    b1 = jnp.zeros((NH_P, 1), jnp.float32).at[:NH, 0].set(params["b_shared"])

    # fused gamma/beta weight: [o, (ky, kx, c_padded)] matches in-kernel im2col.
    w_gb = jnp.concatenate([params["w_gamma"], params["w_beta"]], axis=0)  # (2C, NH, 3, 3)
    w_gb = w_gb.transpose(0, 2, 3, 1)                        # (2C, 3, 3, NH)
    w_gb = jnp.pad(w_gb, ((0, 0), (0, 0), (0, 0), (0, NH_P - NH)))
    w2 = w_gb.reshape(2 * C_IN, 9 * NH_P)

    b2 = jnp.concatenate([params["b_gamma"], params["b_beta"]]).reshape(2 * C_IN, 1)
    return (w1.astype(compute_dtype), b1, w2.astype(compute_dtype),
            b2.astype(jnp.float32), NH_P)


def spade_forward(x, segmap, params, eps=1e-5, compute_dtype=jnp.bfloat16):
    """x: (B, C_in, H, W), segmap: (B, C_seg, Hs, Ws)  ->  (B, C_in, H, W)."""
    B, C_IN, H, W = x.shape
    C_SEG = segmap.shape[1]
    L = H * W
    PAD = _round_up(W + 1, 128)   # lane-aligned zero extension for the conv2 halo

    seg = _nearest_resize_nchw(segmap, H, W)                 # (B, C_SEG, H, W)
    patches1 = _im2col_3x3(seg).astype(compute_dtype)        # (B, 9*C_SEG, L)
    w1, b1, w2, b2, NH_P = _pack_params(params, compute_dtype)
    x_flat = x.reshape(B, C_IN, L)

    kernel = functools.partial(_spade_kernel, C_IN=C_IN, NH_P=NH_P, W=W, L=L,
                               PAD=PAD, eps=eps, compute_dtype=compute_dtype)

    grid_spec = pltpu.PrefetchScalarGridSpec(
        num_scalar_prefetch=0,
        grid=(B,),
        in_specs=[
            pl.BlockSpec((1, C_IN, L), lambda b: (b, 0, 0)),          # x (lane-dense)
            pl.BlockSpec((1, 9 * C_SEG, L), lambda b: (b, 0, 0)),     # conv1 patches
            pl.BlockSpec((NH_P, 9 * C_SEG), lambda b: (0, 0)),        # w1
            pl.BlockSpec((NH_P, 1), lambda b: (0, 0)),                # b1
            pl.BlockSpec((2 * C_IN, 9 * NH_P), lambda b: (0, 0)),     # fused w_gamma|w_beta
            pl.BlockSpec((2 * C_IN, 1), lambda b: (0, 0)),            # fused b_gamma|b_beta
        ],
        out_specs=pl.BlockSpec((1, C_IN, L), lambda b: (b, 0, 0)),    # lane-dense output
    )

    out_flat = pl.pallas_call(
        kernel,
        out_shape=jax.ShapeDtypeStruct((B, C_IN, L), x.dtype),
        grid_spec=grid_spec,
        compiler_params=pltpu.CompilerParams(dimension_semantics=("parallel",)),
    )(x_flat, patches1, w1, b1, w2, b2)
    return out_flat.reshape(B, C_IN, H, W)


def spade_reference(x, segmap, params, eps=1e-5):
    """Pure-JAX NCHW reference mirroring the PyTorch module."""
    mean = jnp.mean(x, axis=(2, 3), keepdims=True)
    var = jnp.mean((x - mean) ** 2, axis=(2, 3), keepdims=True)
    normalized = (x - mean) / jnp.sqrt(var + eps)
    seg = _nearest_resize_nchw(segmap, x.shape[2], x.shape[3])
    dn = ('NCHW', 'OIHW', 'NCHW')
    conv = lambda a, w, b: (lax.conv_general_dilated(a, w, (1, 1), 'SAME',
                                                     dimension_numbers=dn)
                            + b.reshape(1, -1, 1, 1))
    actv = jnp.maximum(conv(seg, params["w_shared"], params["b_shared"]), 0.0)
    gamma = conv(actv, params["w_gamma"], params["b_gamma"])
    beta = conv(actv, params["w_beta"], params["b_beta"])
    return normalized * (1.0 + gamma) + beta


if __name__ == "__main__":
    # x: (B=2, C_in=4, H=16, W=16); segmap: (B=2, C_seg=16, 8, 8) -> nhidden = 4
    B, C_IN, H, W = 2, 4, 16, 16
    C_SEG, HS, WS = 16, 8, 8
    NH = C_SEG // 4

    key = jax.random.PRNGKey(0)
    ks = jax.random.split(key, 8)
    x = jax.random.normal(ks[0], (B, C_IN, H, W), jnp.float32)
    segmap = jax.random.normal(ks[1], (B, C_SEG, HS, WS), jnp.float32)

    params = {
        "w_shared": 0.1 * jax.random.normal(ks[2], (NH, C_SEG, 3, 3), jnp.float32),
        "b_shared": 0.1 * jax.random.normal(ks[3], (NH,), jnp.float32),
        "w_gamma":  0.1 * jax.random.normal(ks[4], (C_IN, NH, 3, 3), jnp.float32),
        "b_gamma":  0.1 * jax.random.normal(ks[5], (C_IN,), jnp.float32),
        "w_beta":   0.1 * jax.random.normal(ks[6], (C_IN, NH, 3, 3), jnp.float32),
        "b_beta":   0.1 * jax.random.normal(ks[7], (C_IN,), jnp.float32),
    }

    ref = spade_reference(x, segmap, params)

    # Exact-precision path (f32 matmul operands): tight tolerance.
    out_f32 = spade_forward(x, segmap, params, compute_dtype=jnp.float32)
    out_f32 = jax.block_until_ready(out_f32)
    assert out_f32.shape == (B, C_IN, H, W)
    assert jnp.allclose(out_f32, ref, atol=1e-4, rtol=1e-4), (
        f"f32 max abs err {jnp.max(jnp.abs(out_f32 - ref))}")

    # bf16 matmul operands (f32 accumulation): loose tolerance sanity check.
    out_bf16 = spade_forward(x, segmap, params, compute_dtype=jnp.bfloat16)
    out_bf16 = jax.block_until_ready(out_bf16)
    assert out_bf16.shape == (B, C_IN, H, W)
    assert float(jnp.max(jnp.abs(out_bf16 - ref))) < 0.25, (
        f"bf16 max abs err {jnp.max(jnp.abs(out_bf16 - ref))}")

    print("KERNEL_OK")
</pallas_src>

<mosaic_0001>
module attributes {stable_mosaic.version = 11 : i64} {
  func.func @_spade_kernel(%arg0: i32, %arg1: memref<1x4x256xf32, #tpu.memory_space<vmem>>, %arg2: memref<1x144x256xf32, #tpu.memory_space<vmem>>, %arg3: memref<8x144xf32, #tpu.memory_space<vmem>>, %arg4: memref<8x1xf32, #tpu.memory_space<vmem>>, %arg5: memref<8x72xf32, #tpu.memory_space<vmem>>, %arg6: memref<8x1xf32, #tpu.memory_space<vmem>>, %arg7: memref<1x4x256xf32, #tpu.memory_space<vmem>>) attributes {dimension_semantics = [#tpu.dimension_semantics<parallel>], iteration_bounds = array<i64: 2>, scalar_prefetch = 0 : i64, scratch_operands = 0 : i64, tpu.core_type = #tpu.core_type<tc>, window_params = [{transform_indices = @transform_0, window_bounds = array<i64: 1, 4, 256>}, {transform_indices = @transform_1, window_bounds = array<i64: 1, 144, 256>}, {pipeline_mode = #tpu.pipeline_mode<synchronous>, transform_indices = @transform_2, window_bounds = array<i64: 8, 144>}, {pipeline_mode = #tpu.pipeline_mode<synchronous>, transform_indices = @transform_3, window_bounds = array<i64: 8, 1>}, {pipeline_mode = #tpu.pipeline_mode<synchronous>, transform_indices = @transform_4, window_bounds = array<i64: 8, 72>}, {pipeline_mode = #tpu.pipeline_mode<synchronous>, transform_indices = @transform_5, window_bounds = array<i64: 8, 1>}, {transform_indices = @transform_6, window_bounds = array<i64: 1, 4, 256>}]} {
    %c0 = arith.constant 0 : index
    %c0_0 = arith.constant 0 : index
    %c0_1 = arith.constant 0 : index
    %0 = vector.load %arg1[%c0, %c0_0, %c0_1] : memref<1x4x256xf32, #tpu.memory_space<vmem>>, vector<1x4x256xf32>
    %1 = vector.shape_cast %0 : vector<1x4x256xf32> to vector<4x256xf32>
    %cst = arith.constant dense<0.000000e+00> : vector<4xf32>
    %2 = vector.multi_reduction <add>, %1, %cst [1] : vector<4x256xf32> to vector<4xf32>
    %3 = vector.shape_cast %2 : vector<4xf32> to vector<4x1xf32>
    %cst_2 = arith.constant 2.560000e+02 : f32
    %4 = vector.broadcast %cst_2 : f32 to vector<4x1xf32>
    %5 = arith.divf %3, %4 : vector<4x1xf32>
    %6 = vector.broadcast %5 : vector<4x1xf32> to vector<4x256xf32>
    %7 = arith.subf %1, %6 : vector<4x256xf32>
    %8 = arith.mulf %7, %7 : vector<4x256xf32>
    %cst_3 = arith.constant dense<0.000000e+00> : vector<4xf32>
    %9 = vector.multi_reduction <add>, %8, %cst_3 [1] : vector<4x256xf32> to vector<4xf32>
    %10 = vector.shape_cast %9 : vector<4xf32> to vector<4x1xf32>
    %cst_4 = arith.constant 2.560000e+02 : f32
    %11 = vector.broadcast %cst_4 : f32 to vector<4x1xf32>
    %12 = arith.divf %10, %11 : vector<4x1xf32>
    %cst_5 = arith.constant 9.99999974E-6 : f32
    %13 = vector.broadcast %cst_5 : f32 to vector<4x1xf32>
    %14 = arith.addf %12, %13 : vector<4x1xf32>
    %15 = math.rsqrt %14 : vector<4x1xf32>
    %c0_6 = arith.constant 0 : index
    %c0_7 = arith.constant 0 : index
    %16 = vector.load %arg3[%c0_6, %c0_7] : memref<8x144xf32, #tpu.memory_space<vmem>>, vector<8x144xf32>
    %c0_8 = arith.constant 0 : index
    %c0_9 = arith.constant 0 : index
    %c0_10 = arith.constant 0 : index
    %17 = vector.load %arg2[%c0_8, %c0_9, %c0_10] : memref<1x144x256xf32, #tpu.memory_space<vmem>>, vector<1x144x256xf32>
    %18 = vector.shape_cast %17 : vector<1x144x256xf32> to vector<144x256xf32>
    %cst_11 = arith.constant dense<0.000000e+00> : vector<8x256xf32>
    %19 = tpu.matmul %16, %18, %cst_11 {dimension_numbers = #tpu.dot_dimension_numbers<[1], [0], [0], [1], [0, 0, 1, 1], [], []>} : vector<8x144xf32>, vector<144x256xf32>, vector<8x256xf32> -> vector<8x256xf32>
    %c0_12 = arith.constant 0 : index
    %c0_13 = arith.constant 0 : index
    %20 = vector.load %arg4[%c0_12, %c0_13] : memref<8x1xf32, #tpu.memory_space<vmem>>, vector<8x1xf32>
    %21 = vector.broadcast %20 : vector<8x1xf32> to vector<8x256xf32>
    %22 = arith.addf %19, %21 : vector<8x256xf32>
    %cst_14 = arith.constant 0.000000e+00 : f32
    %23 = vector.broadcast %cst_14 : f32 to vector<8x256xf32>
    %24 = arith.maximumf %22, %23 : vector<8x256xf32>
    %cst_15 = arith.constant 0.000000e+00 : f32
    %25 = vector.broadcast %cst_15 : f32 to vector<8x128xf32>
    %26 = tpu.concatenate %25, %24, %25 in 1 : vector<8x128xf32>, vector<8x256xf32>, vector<8x128xf32> -> vector<8x512xf32>
    %27 = tpu.iota {dimensions = array<i32: 1>} : vector<1x256xi32>
    %c16_i32 = arith.constant 16 : i32
    %c0_i32 = arith.constant 0 : i32
    %28 = arith.cmpi eq, %c16_i32, %c0_i32 : i32
    %c1_i32 = arith.constant 1 : i32
    %29 = arith.select %28, %c1_i32, %c16_i32 : i32
    %30 = vector.broadcast %29 : i32 to vector<1x256xi32>
    %31 = arith.remsi %27, %30 : vector<1x256xi32>
    %c0_i32_16 = arith.constant 0 : i32
    %32 = vector.broadcast %c0_i32_16 : i32 to vector<1x256xi32>
    %33 = arith.cmpi ne, %31, %32 : vector<1x256xi32>
    %c0_i32_17 = arith.constant 0 : i32
    %34 = vector.broadcast %c0_i32_17 : i32 to vector<1x256xi32>
    %35 = arith.cmpi slt, %31, %34 : vector<1x256xi32>
    %c0_i32_18 = arith.constant 0 : i32
    %36 = arith.cmpi slt, %29, %c0_i32_18 : i32
    %37 = vector.broadcast %36 : i1 to vector<1x256xi1>
    %38 = vector.broadcast %37 : vector<1x256xi1> to vector<1x256xi1>
    %39 = arith.xori %35, %38 : vector<1x256xi1>
    %40 = arith.andi %39, %33 : vector<1x256xi1>
    %41 = vector.broadcast %29 : i32 to vector<1x256xi32>
    %42 = arith.addi %31, %41 : vector<1x256xi32>
    %43 = arith.select %40, %42, %31 : vector<1x256xi1>, vector<1x256xi32>
    %c1_i32_19 = arith.constant 1 : i32
    %44 = vector.broadcast %c1_i32_19 : i32 to vector<1x256xi32>
    %45 = arith.cmpi sge, %43, %44 : vector<1x256xi32>
    %c14_i32 = arith.constant 14 : i32
    %46 = vector.broadcast %c14_i32 : i32 to vector<1x256xi32>
    %47 = arith.cmpi sle, %43, %46 : vector<1x256xi32>
    %48 = vector.extract_strided_slice %26 {offsets = [0, 111], sizes = [8, 256], strides = [1, 1]} : vector<8x512xf32> to vector<8x256xf32>
    %cst_20 = arith.constant 0.000000e+00 : f32
    %49 = vector.shape_cast %45 : vector<1x256xi1> to vector<1x256xi1>
    %50 = vector.broadcast %49 : vector<1x256xi1> to vector<8x256xi1>
    %51 = vector.broadcast %cst_20 : f32 to vector<8x256xf32>
    %52 = arith.select %50, %48, %51 : vector<8x256xi1>, vector<8x256xf32>
    %53 = vector.extract_strided_slice %26 {offsets = [0, 112], sizes = [8, 256], strides = [1, 1]} : vector<8x512xf32> to vector<8x256xf32>
    %54 = vector.extract_strided_slice %26 {offsets = [0, 113], sizes = [8, 256], strides = [1, 1]} : vector<8x512xf32> to vector<8x256xf32>
    %cst_21 = arith.constant 0.000000e+00 : f32
    %55 = vector.shape_cast %47 : vector<1x256xi1> to vector<1x256xi1>
    %56 = vector.broadcast %55 : vector<1x256xi1> to vector<8x256xi1>
    %57 = vector.broadcast %cst_21 : f32 to vector<8x256xf32>
    %58 = arith.select %56, %54, %57 : vector<8x256xi1>, vector<8x256xf32>
    %59 = vector.extract_strided_slice %26 {offsets = [0, 127], sizes = [8, 256], strides = [1, 1]} : vector<8x512xf32> to vector<8x256xf32>
    %cst_22 = arith.constant 0.000000e+00 : f32
    %60 = vector.shape_cast %45 : vector<1x256xi1> to vector<1x256xi1>
    %61 = vector.broadcast %60 : vector<1x256xi1> to vector<8x256xi1>
    %62 = vector.broadcast %cst_22 : f32 to vector<8x256xf32>
    %63 = arith.select %61, %59, %62 : vector<8x256xi1>, vector<8x256xf32>
    %64 = vector.extract_strided_slice %26 {offsets = [0, 128], sizes = [8, 256], strides = [1, 1]} : vector<8x512xf32> to vector<8x256xf32>
    %65 = vector.extract_strided_slice %26 {offsets = [0, 129], sizes = [8, 256], strides = [1, 1]} : vector<8x512xf32> to vector<8x256xf32>
    %cst_23 = arith.constant 0.000000e+00 : f32
    %66 = vector.shape_cast %47 : vector<1x256xi1> to vector<1x256xi1>
    %67 = vector.broadcast %66 : vector<1x256xi1> to vector<8x256xi1>
    %68 = vector.broadcast %cst_23 : f32 to vector<8x256xf32>
    %69 = arith.select %67, %65, %68 : vector<8x256xi1>, vector<8x256xf32>
    %70 = vector.extract_strided_slice %26 {offsets = [0, 143], sizes = [8, 256], strides = [1, 1]} : vector<8x512xf32> to vector<8x256xf32>
    %cst_24 = arith.constant 0.000000e+00 : f32
    %71 = vector.shape_cast %45 : vector<1x256xi1> to vector<1x256xi1>
    %72 = vector.broadcast %71 : vector<1x256xi1> to vector<8x256xi1>
    %73 = vector.broadcast %cst_24 : f32 to vector<8x256xf32>
    %74 = arith.select %72, %70, %73 : vector<8x256xi1>, vector<8x256xf32>
    %75 = vector.extract_strided_slice %26 {offsets = [0, 144], sizes = [8, 256], strides = [1, 1]} : vector<8x512xf32> to vector<8x256xf32>
    %76 = vector.extract_strided_slice %26 {offsets = [0, 145], sizes = [8, 256], strides = [1, 1]} : vector<8x512xf32> to vector<8x256xf32>
    %cst_25 = arith.constant 0.000000e+00 : f32
    %77 = vector.shape_cast %47 : vector<1x256xi1> to vector<1x256xi1>
    %78 = vector.broadcast %77 : vector<1x256xi1> to vector<8x256xi1>
    %79 = vector.broadcast %cst_25 : f32 to vector<8x256xf32>
    %80 = arith.select %78, %76, %79 : vector<8x256xi1>, vector<8x256xf32>
    %81 = tpu.concatenate %52, %53, %58, %63, %64, %69, %74, %75, %80 in 0 : vector<8x256xf32>, vector<8x256xf32>, vector<8x256xf32>, vector<8x256xf32>, vector<8x256xf32>, vector<8x256xf32>, vector<8x256xf32>, vector<8x256xf32>, vector<8x256xf32> -> vector<72x256xf32>
    %c0_26 = arith.constant 0 : index
    %c0_27 = arith.constant 0 : index
    %82 = vector.load %arg5[%c0_26, %c0_27] : memref<8x72xf32, #tpu.memory_space<vmem>>, vector<8x72xf32>
    %cst_28 = arith.constant dense<0.000000e+00> : vector<8x256xf32>
    %83 = tpu.matmul %82, %81, %cst_28 {dimension_numbers = #tpu.dot_dimension_numbers<[1], [0], [0], [1], [0, 0, 1, 1], [], []>} : vector<8x72xf32>, vector<72x256xf32>, vector<8x256xf32> -> vector<8x256xf32>
    %c0_29 = arith.constant 0 : index
    %c0_30 = arith.constant 0 : index
    %84 = vector.load %arg6[%c0_29, %c0_30] : memref<8x1xf32, #tpu.memory_space<vmem>>, vector<8x1xf32>
    %85 = vector.broadcast %84 : vector<8x1xf32> to vector<8x256xf32>
    %86 = arith.addf %83, %85 : vector<8x256xf32>
    %87 = vector.extract_strided_slice %86 {offsets = [0, 0], sizes = [4, 256], strides = [1, 1]} : vector<8x256xf32> to vector<4x256xf32>
    %88 = vector.extract_strided_slice %86 {offsets = [4, 0], sizes = [4, 256], strides = [1, 1]} : vector<8x256xf32> to vector<4x256xf32>
    %89 = vector.broadcast %5 : vector<4x1xf32> to vector<4x256xf32>
    %90 = arith.subf %1, %89 : vector<4x256xf32>
    %cst_31 = arith.constant 1.000000e+00 : f32
    %91 = vector.broadcast %cst_31 : f32 to vector<4x256xf32>
    %92 = arith.addf %91, %87 : vector<4x256xf32>
    %93 = vector.broadcast %15 : vector<4x1xf32> to vector<4x256xf32>
    %94 = arith.mulf %93, %92 : vector<4x256xf32>
    %95 = arith.mulf %90, %94 : vector<4x256xf32>
    %96 = arith.addf %95, %88 : vector<4x256xf32>
    %c0_32 = arith.constant 0 : index
    %c0_33 = arith.constant 0 : index
    %c0_34 = arith.constant 0 : index
    %97 = vector.load %arg7[%c0_32, %c0_33, %c0_34] : memref<1x4x256xf32, #tpu.memory_space<vmem>>, vector<1x4x256xf32>
    %98 = vector.shape_cast %97 : vector<1x4x256xf32> to vector<4x256xf32>
    %99 = vector.shape_cast %96 : vector<4x256xf32> to vector<1x4x256xf32>
    tpu.vector_store %arg7[%c0_32, %c0_33, %c0_34], %99 {strides = array<i32>} : memref<1x4x256xf32, #tpu.memory_space<vmem>>, vector<1x4x256xf32>,
    return
  }
  func.func @transform_0(%arg0: i32) -> (i32, i32, i32) {
    %c0_i32 = arith.constant 0 : i32
    %c0_i32_0 = arith.constant 0 : i32
    %c0_i32_1 = arith.constant 0 : i32
    return %arg0, %c0_i32, %c0_i32_0 : i32, i32, i32
  }
  func.func @transform_1(%arg0: i32) -> (i32, i32, i32) {
    %c0_i32 = arith.constant 0 : i32
    %c0_i32_0 = arith.constant 0 : i32
    %c0_i32_1 = arith.constant 0 : i32
    return %arg0, %c0_i32, %c0_i32_0 : i32, i32, i32
  }
  func.func @transform_2(%arg0: i32) -> (i32, i32) {
    %c0_i32 = arith.constant 0 : i32
    %c0_i32_0 = arith.constant 0 : i32
    %c0_i32_1 = arith.constant 0 : i32
    return %c0_i32, %c0_i32_0 : i32, i32
  }
  func.func @transform_3(%arg0: i32) -> (i32, i32) {
    %c0_i32 = arith.constant 0 : i32
    %c0_i32_0 = arith.constant 0 : i32
    %c0_i32_1 = arith.constant 0 : i32
    return %c0_i32, %c0_i32_0 : i32, i32
  }
  func.func @transform_4(%arg0: i32) -> (i32, i32) {
    %c0_i32 = arith.constant 0 : i32
    %c0_i32_0 = arith.constant 0 : i32
    %c0_i32_1 = arith.constant 0 : i32
    return %c0_i32, %c0_i32_0 : i32, i32
  }
  func.func @transform_5(%arg0: i32) -> (i32, i32) {
    %c0_i32 = arith.constant 0 : i32
    %c0_i32_0 = arith.constant 0 : i32
    %c0_i32_1 = arith.constant 0 : i32
    return %c0_i32, %c0_i32_0 : i32, i32
  }
  func.func @transform_6(%arg0: i32) -> (i32, i32, i32) {
    %c0_i32 = arith.constant 0 : i32
    %c0_i32_0 = arith.constant 0 : i32
    %c0_i32_1 = arith.constant 0 : i32
    return %arg0, %c0_i32, %c0_i32_0 : i32, i32, i32
  }
}

</mosaic_0001>

<bundles_post_ra>
// kernel: tpu_custom_call.1
= control target key start
LH: loop header
LB: loop body
LE: loop exit
PB: predicated region body
PF: predicated region fallthrough
CT: control target
= control target key end

     0   :  { %11 = vsyncpa [#allocation3], 0  ;;  %s1538_s0 = inlined_call_operand.vmem [shape: f32[2,4,256], index: 0, kind: input, shape index: {}]   ;;  %s1539_s1 = inlined_call_operand.hbm [shape: f32[2,144,256], index: 1, kind: input, shape index: {}]   ;;  %s1540_s2 = inlined_call_operand.hbm [shape: f32[8,144], index: 2, kind: input, shape index: {}]   ;;  %s1541_s3 = inlined_call_operand.vmem [shape: f32[8,1], index: 3, kind: input, shape index: {}]   ;;  %s1542_s4 = inlined_call_operand.vmem [shape: f32[8,72], index: 4, kind: input, shape index: {}]   ;;  %s1543_s5 = inlined_call_operand.vmem [shape: f32[8,1], index: 5, kind: input, shape index: {}]   ;;  %s1544_s6 = inlined_call_operand.hbm [shape: f32[2,4,256], index: 6, kind: output, shape index: {}]  }
   0x1   :  { %13 = vsyncpa [#allocation3 + $0x1], 0 }
   0x2   :  { %14 = vsyncpa [#allocation6], 0 }
   0x3   :  { %15 = vsyncpa [#allocation4], 0 }
   0x4   :  { %17 = vsyncpa [#allocation4 + $0x1], 0  ;;  %s1189_s21 = smov 0   ;;  %s1191_s22 = smov 0  }
   0x5   :  { %s1193_s23 = smov 0   ;;  %s1195_s24 = smov 0  }
   0x6 LB: > { %s1210_s25 = sadd.s32 4294967295, %s1135_s24   ;;  %s803_s26 = sadd.s32 4294967294, %s1135_s24   ;;  %s1135_s24 = sphi %s1195_s24, %s1581_s24   ;;  %s1131_s23 = sphi %s1193_s23, %s1580_s23   ;;  %s1127_s22 = sphi %s1191_s22, %s1579_s22   ;;  %s1123_s21 = sphi %s1189_s21, %s1578_s21  }
   0x7   : > { %s1214_s27 = sadd.s32 1, %s1135_s24   ;;  %s56_s28 = sadd.s32 1, %s1131_s23 }
   0x8   : > { %s53_s29 = ssub.s32 %s1135_s24, %s1214_s27  ;;  %p63_p0 = scmp.ne.s32.totalorder %s1131_s23, %s1127_s22 }
   0x9   : > { %p54_p1 = scmp.eq.s32.totalorder %s53_s29, 0  ;;  %p64_p2 = scmp.eq.s32.totalorder %s1135_s24, 0 }
   0xa   : > { %p69_p3 = scmp.ne.s32.totalorder %s1127_s22, %s1123_s21  ;;  %p1545_p4 = scmp.eq.s32.totalorder %s1210_s25, 0 }
   0xb   : > { %s1226_s30 = scalar_select %p54_p1, %s1131_s23, %s56_s28  }
   0xc   : > { %p1228_p5 = por %p64_p2, %p63_p0  ;;  %p1234_p6 = por %p1545_p4, %p69_p3 }
   0xd   : > { %p177_p7 = scmp.eq.s32.totalorder %s1210_s25, 1  ;;  %p183_p8 = scmp.eq.s32.totalorder %s803_s26, 1 }
   0xe   : > { %s1551_s8 = scalar_select %p1234_p6, 1, 0 }
   0xf   : > { %p804_p9 = scmp.ge.s32.totalorder %s1135_s24, 1  ;;  %p190_p10 = scmp.lt.s32.totalorder %s1135_s24, 3 }
  0x10   : > { %p1241_p11 = por %p177_p7, %p63_p0  ;;  %p1245_p12 = por %p183_p8, %p69_p3 }
  0x11   : > { %p1249_p13 = pnand %p804_p9, %p190_p10  ;;  %s1137_s12 = smov [#allocation5]  }
  0x12   : > { %s1552_s9 = scalar_select %p1241_p11, 1, 0 }
  0x13   : > { %s1553_s10 = scalar_select %p1245_p12, 1, 0 }
  0x14   : > { %s1554_s11 = scalar_select %p1249_p13, 1, 0 }
  0x15   : > { %p905_p2 = pneg %p1249_p13  ;;  %s203_s13 = sshll.u32 %s1137_s12, 4  ;;  %s204_s13 = int_to_ptr.vmem [resolvable:$true] %s203_s13 }
  0x16   : > { %p918_p4 = scmp.lt.s32.totalorder %s1135_s24, 2  ;;  %p1555_p0 = scmp.eq.s32.totalorder %s1210_s25, 0 }
  0x17   : > { %s231_s15 = sand.u32 1, %s1131_s23   ;;  %s1007_s20 = scalar_lea.hbm %s1540_s2, 256 }
  0x18   : > { %p1259_p7 = pnand %p905_p2, %p1555_p0  ;;  %p1266_p3 = pnand %p918_p4, %p1228_p5 }
  0x19   : > { %s894_s17 = smul.u32 288, %s231_s15  ;;  %p1008_p8 = scmp.ne.s32.totalorder %s1540_s2, %s1007_s20 }
  0x1a   : > { %s1557_s16 = scalar_select %p1266_p3, 1, 0 }
  0x1b   : > { %p1009_p9 = pneg %p1259_p7  ;;  %p1014_p4 = scmp.lt.u32.totalorder %s1007_s20, %s1540_s2 }
  0x1d   : > { %p1010_p10 = pnand %p1009_p9, %p1008_p8 }
  0x1f   : > { %p1011_p2 = pneg %p1010_p10 }
  0x21   : > { %p1016_p5 = pnand %p1014_p4, %p1011_p2 }
  0x23   : > { %1019 = shalt.err (!%p1016_p5)
}
  0x24   : > { %s1020_s7 = scalar_lea.vmem %s204_s13, 256  ;;  %p1028_p11 = scmp.lt.s32.totalorder %s204_s13, %s204_s13 }
  0x25   : > { %p1021_p0 = scmp.ne.s32.totalorder %s204_s13, %s1020_s7  ;;  %p1029_p6 = scmp.lt.s32.totalorder %s1020_s7, %s1020_s7 }
  0x27   : > { %p1023_p1 = pnand %p1021_p0, %p1009_p9  ;;  %p1030_p13 = por %p1029_p6, %p1028_p11 }
  0x29   : > { %p1024_p12 = pneg %p1023_p1 }
  0x2b   : > { %p1031_p3 = pnand %p1030_p13, %p1024_p12 }
  0x2d   : > { %1034 = shalt.err (!%p1031_p3)
}
  0x2e   : > { %908 = dma.hbm_to_vmem [thread:$0]  (!%p1259_p7), %s1540_s2, 256, %s204_s13, [#allocation6]  }
  0x2f   : > { %s895_s20 = smul.u32 4608, %s1135_s24  ;;  %s235_s26 = scalar_lea.vmem [#allocation2], %s894_s17 }
  0x30   : > { %s242_s28 = sshll.u32 %s235_s26, 4  ;;  %s1294_s14 = scalar_lea.sflag [#allocation3], %s231_s15  ;;  %s1287_s28 = int_to_ptr.vmem [resolvable:$true] %s242_s28 }
  0x31   : > { %s1292_s7 = scalar_lea.hbm %s1539_s1, %s895_s20  ;;  %p1558_p11 = scmp.ne.s32.totalorder %s1557_s16, 0 }
  0x32   : > { %s1035_s18 = scalar_lea.hbm %s1292_s7, 4608  ;;  %s1040_s19 = scalar_lea.hbm %s1539_s1, 9216 }
  0x33   : > { %p1036_p6 = scmp.ne.s32.totalorder %s1292_s7, %s1035_s18  ;;  %p1037_p12 = pneg %p1558_p11 }
  0x34   : > { %p1041_p7 = scmp.lt.u32.totalorder %s1292_s7, %s1539_s1  ;;  %p1042_p3 = scmp.lt.u32.totalorder %s1040_s19, %s1035_s18 }
  0x35   : > { %p1038_p13 = pnand %p1037_p12, %p1036_p6  ;;  %p1044_p9 = scmp.lt.u32.totalorder %s1035_s18, %s1292_s7 }
  0x36   : > { %p1043_p8 = por %p1042_p3, %p1041_p7 }
  0x37   : > { %p1039_p1 = pneg %p1038_p13 }
  0x38   : > { %p1045_p10 = por %p1044_p9, %p1043_p8 }
  0x3a   : > { %p1046_p2 = pnand %p1045_p10, %p1039_p1 }
  0x3c   : > { %1049 = shalt.err (!%p1046_p2)
}
  0x3d   : > { %s1050_s15 = scalar_lea.vmem %s1287_s28, 4608  ;;  %s1138_s29 = smov [#allocation2]  }
  0x3e   : > { %p1051_p4 = scmp.ne.s32.totalorder %s1287_s28, %s1050_s15  ;;  %s1055_s12 = sshll.u32 %s1138_s29, 4  ;;  %s1056_s12 = int_to_ptr.vmem [resolvable:$false] %s1055_s12 }
  0x3f   : > { %s1057_s13 = scalar_lea.vmem %s1056_s12, 9216  ;;  %p1058_p6 = scmp.lt.s32.totalorder %s1287_s28, %s1056_s12 }
  0x40   : > { %p1053_p5 = pnand %p1051_p4, %p1037_p12  ;;  %p1059_p13 = scmp.lt.s32.totalorder %s1057_s13, %s1050_s15 }
  0x42   : > { %p1054_p0 = pneg %p1053_p5  ;;  %p1060_p7 = por %p1059_p13, %p1058_p6 }
  0x44   : > { %p1061_p3 = pnand %p1060_p7, %p1054_p0 }
  0x46   : > { %1064 = shalt.err (!%p1061_p3)
}
  0x47   : > { %s1139_s18 = smov 256   ;;  %s1140_s17 = smov 16  }
  0x48   : > { %912 = dma.hbm_to_vmem [thread:$0]  (!%p1558_p11), %s1292_s7, 4608, %s1287_s28, %s1294_s14, %s1139_s18, %s1139_s18, %s1140_s17  }
  0x49   : > { %p1559_p12 = scmp.ne.s32.totalorder %s1554_s11, 0 }
  0x4a   : > { %s1325_s19 = sand.u32 (!%p1559_p12), 1, %s1127_s22   ;;  %p1560_p1 = scmp.ne.s32.totalorder (!%p1559_p12), %s1551_s8, 0 }
  0x4b   : > { %254 = sbr.rel (%p1559_p12) target bundleno = 729 (0x2d9), region = 44  ;;  %s257_s26 = scalar_lea.sflag (!%p1559_p12), [#allocation3], %s1325_s19 }
  0x4c   : > { %s896_s20 = smul.u32 (!%p1559_p12), 288, %s1325_s19 }
  0x4e   : > { %s1329_s15 = scalar_lea.vmem (!%p1559_p12), [#allocation2], %s896_s20 }
  0x52   : > { %1110 = dma.done.wait (%p1560_p1), %s257_s26, 4608  }
  0x53   : > { %1112 = vsyncadd (%p1560_p1), %s257_s26, 4294962688  ;;  %p1561_p11 = scmp.eq.s32.totalorder %s1210_s25, 0 }
  0x55   : > { %1114 = dma.done.wait (%p1561_p11), [#allocation6], 256   ;;  %p1562_p8 = pmov %p1561_p11 }
  0x56   : > { %v1141_v0 = vmov 0   ;;  %v1142_v1 = vmov 0.0   ;;  %s1143_s8 = smov 17   ;;  %v340_v2 = vld [vmem:[%s1329_s15 + $0x8] sm:$0xff]  ;;  %v342_v3 = vld [vmem:[%s1329_s15 + $0x18] sm:$0xff]  ;;  %v339_v4 = vld [vmem:[%s1329_s15] sm:$0xff] }
  0x57   : > { %1116 = vsyncadd (%p1562_p8), [#allocation6], 4294967040  ;;  %968 = vset.pattern.permute.xlu0 %v1141_v0  ;;  %496 = vrot.lane.b32.xlu1 %v1142_v1, %s1143_s8  ;;  %v834_v5 = vpack.c.bf16 %v342_v3, %v340_v2  ;;  %v341_v6 = vld [vmem:[%s1329_s15 + $0x10] sm:$0xff]  ;;  %v344_v7 = vld [vmem:[%s1329_s15 + $0x28] sm:$0xff]  ;;  %vm381_vm0 = vcmask 130048   ;;  %s1144_s28 = smov 16  }
  0x58   : > { %674 = vmatprep.mubr.f32.mxu1 %v1142_v1  ;;  %v346_v8 = vld [vmem:[%s1329_s15 + $0x38] sm:$0xff]  ;;  %v836_v9 = vpack.c.bf16 %v341_v6, %v339_v4  ;;  %v343_v11 = vld [vmem:[%s1329_s15 + $0x20] sm:$0xff]  ;;  %v345_v12 = vld [vmem:[%s1329_s15 + $0x30] sm:$0xff]  ;;  %s1145_s7 = smov 15   ;;  %s1146_s14 = smov 1   ;;  %vm307_vm1 = vcmask 1043456  }
  0x59   : > { %v838_v10 = vpack.c.bf16 %v346_v8, %v344_v7  ;;  %v348_v13 = vld [vmem:[%s1329_s15 + $0x48] sm:$0xff]  ;;  %835 = vmatprep.subr.bf16.mxu0 %v834_v5  ;;  %v350_v14 = vld [vmem:[%s1329_s15 + $0x58] sm:$0xff]  ;;  %v840_v15 = vpack.c.bf16 %v345_v12, %v343_v11  ;;  %v347_v17 = vld [vmem:[%s1329_s15 + $0x40] sm:$0xff]  ;;  %s1147_s29 = smov 113   ;;  %s1148_s12 = smov 127   ;;  %vm502_vm3 = vcmask 138240  }
  0x5a   : > { %837 = vmatpush1.bf16.msra.mxu0 %v836_v9  ;;  %v842_v16 = vpack.c.bf16 %v350_v14, %v348_v13  ;;  %v349_v18 = vld [vmem:[%s1329_s15 + $0x50] sm:$0xff]  ;;  %v352_v19 = vld [vmem:[%s1329_s15 + $0x68] sm:$0xff]  ;;  %v354_v20 = vld [vmem:[%s1329_s15 + $0x78] sm:$0xff]  ;;  %s1149_s13 = smov 112   ;;  %s1150_s18 = smov 111   ;;  %vm519_vm5 = vcmask 121856  }
  0x5b   : > { %839 = vmatprep.subr.bf16.mxu0 %v838_v10  ;;  %v844_v21 = vpack.c.bf16 %v349_v18, %v347_v17  ;;  %v846_v22 = vpack.c.bf16 %v354_v20, %v352_v19  ;;  %v351_v23 = vld [vmem:[%s1329_s15 + $0x60] sm:$0xff]  ;;  %v353_v24 = vld [vmem:[%s1329_s15 + $0x70] sm:$0xff]  ;;  %v356_v25 = vld [vmem:[%s1329_s15 + $0x88] sm:$0xff]  ;;  %513 = vrot.lane.b32.xlu1 %v1142_v1, %s1145_s7  ;;  %p298_p9 = scmp.lt.s32.totalorder %s1210_s25, 1  ;;  %v319_v10 = vlaneseq  ;;  %vm532_vm6 = vcmask 7168   ;;  %s697_s26 = scalar_lea.sflag [#allocation4], %s1325_s19 }
  0x5c   : > { %v358_v26 = vld [vmem:[%s1329_s15 + $0x98] sm:$0xff]  ;;  %v848_v27 = vpack.c.bf16 %v353_v24, %v351_v23  ;;  %v338_v28 = vld [vmem:[#allocation5 + $0x8] sm:$0xff]  ;;  %v375_v29 = vld [vmem:[%s1541_s3] sm:$0xff]  ;;  %vm1151_vm7 = vmmov 1   ;;  %vm545_vm14 = vcmask 1039360   ;;  %p1575_p2 = scmp.ne.s32.totalorder %s1552_s9, 0 }
  0x5d   : > { %v850_v30 = vpack.c.bf16 %v358_v26, %v356_v25  ;;  %v355_v31 = vld [vmem:[%s1329_s15 + $0x80] sm:$0xff]  ;;  %v357_v32 = vld [vmem:[%s1329_s15 + $0x90] sm:$0xff]  ;;  %813 = vmatprep.mubr.msk.f32.mxu0 %vm381_vm0, %v338_v28  ;;  %v360_v33 = vld [vmem:[%s1329_s15 + $0xa8] sm:$0xff]  ;;  %378 = vperm.xlu0 %968, %v375_v29   ;;  %s299_s17 = scalar_select %p298_p9, %s1210_s25, 1  ;;  %v459_v13 = vand.u32 127, %v319_v10 }
  0x5e   : > { %841 = vmatpush1.bf16.msra.mxu0 %v840_v15  ;;  %v362_v34 = vld [vmem:[%s1329_s15 + $0xb8] sm:$0xff]  ;;  %v852_v35 = vpack.c.bf16 %v357_v32, %v355_v31  ;;  %v359_v37 = vld [vmem:[%s1329_s15 + $0xa0] sm:$0xff]  ;;  %v361_v38 = vld [vmem:[%s1329_s15 + $0xb0] sm:$0xff] }
  0x5f   : > { %843 = vmatprep.subr.bf16.mxu0 %v842_v16  ;;  %v854_v36 = vpack.c.bf16 %v362_v34, %v360_v33  ;;  %v364_v39 = vld [vmem:[%s1329_s15 + $0xc8] sm:$0xff]  ;;  %v366_v40 = vld [vmem:[%s1329_s15 + $0xd8] sm:$0xff]  ;;  %v856_v41 = vpack.c.bf16 %v361_v38, %v359_v37  ;;  %v363_v43 = vld [vmem:[%s1329_s15 + $0xc0] sm:$0xff]  ;;  %s832_s20 = sshll.u32 %s299_s17, 3  ;;  %v460_v14 = vadd.s32 128, %v459_v13  ;;  %v465_v18 = vand.u32 15, %v459_v13 }
  0x60   : > { %v858_v42 = vpack.c.bf16 %v366_v40, %v364_v39  ;;  %v365_v44 = vld [vmem:[%s1329_s15 + $0xd0] sm:$0xff]  ;;  %v368_v45 = vld [vmem:[%s1329_s15 + $0xe8] sm:$0xff]  ;;  %v370_v46 = vld [vmem:[%s1329_s15 + $0xf8] sm:$0xff] }
  0x61   : > { %578 = vrot.lane.b32.xlu0 %v1142_v1, %s1144_s28  ;;  %v860_v47 = vpack.c.bf16 %v365_v44, %v363_v43  ;;  %v862_v48 = vpack.c.bf16 %v370_v46, %v368_v45  ;;  %v367_v49 = vld [vmem:[%s1329_s15 + $0xe0] sm:$0xff]  ;;  %v369_v50 = vld [vmem:[%s1329_s15 + $0xf0] sm:$0xff]  ;;  %v372_v51 = vld [vmem:[%s1329_s15 + $0x108] sm:$0xff]  ;;  %v472_v17 = vand.u32 15, %v460_v14  ;;  %vm1422_vm4 = vcmp.ge.s32.totalorder %v465_v18, 1 }
  0x62   : > { %845 = vmatpush1.bf16.msra.mxu0 %v844_v21  ;;  %v374_v52 = vld [vmem:[%s1329_s15 + $0x118] sm:$0xff]  ;;  %v864_v53 = vpack.c.bf16 %v369_v50, %v367_v49  ;;  %v371_v55 = vld [vmem:[%s1329_s15 + $0x100] sm:$0xff]  ;;  %v373_v56 = vld [vmem:[%s1329_s15 + $0x110] sm:$0xff]  ;;  %vm1446_vm11 = vcmp.le.s32.totalorder %v465_v18, 14  ;;  %v320_v18 = vshrl.u32 %v319_v10, 7 }
  0x63   : > { %847 = vmatprep.subr.bf16.mxu0 %v846_v22  ;;  %v866_v54 = vpack.c.bf16 %v374_v52, %v372_v51  ;;  %v868_v57 = vpack.c.bf16 %v373_v56, %v371_v55  ;;  %v337_v58 = vld [vmem:[#allocation5] sm:$0xff]  ;;  %vm1418_vm2 = vcmp.ge.s32.totalorder %v472_v17, 1  ;;  %vm1435_vm9 = vcmp.le.s32.totalorder %v472_v17, 14  ;;  %vm1442_vm10 = vmpackc.low %vm1151_vm7, %vm1422_vm4 }
  0x64   : > { %v600_v9 = vld [vmem:[%s1543_s5] sm:$0xff]  ;;  %vm1430_vm8 = vmpackc.low %vm1151_vm7, %vm1418_vm2 }
  0x65   : > { %526 = vrot.lane.b32.xlu0 %v1142_v1, %s1146_s14  ;;  %vm877_vm12 = vmpackc.low %vm1418_vm2, %vm1435_vm9  ;;  %vm594_vm2 = vcmask 916480   ;;  %v599_v14 = vld [vmem:[%s1542_s4] sm:$0xff] }
  0x66   : > { %849 = vmatpush1.bf16.msra.mxu0 %v848_v27  ;;  %vm880_vm13 = vmpackc.low %vm1422_vm4, %vm1446_vm11  ;;  %vm571_vm4 = vcmask 908288  }
  0x67   : > { %851 = vmatprep.subr.bf16.mxu0 %v850_v30  ;;  %vm883_vm15 = vmpackc.low %vm1435_vm9, %vm1151_vm7 }
  0x6a   : > { %853 = vmatpush1.bf16.msra.mxu0 %v852_v35 }
  0x6b   : > { %855 = vmatprep.subr.bf16.mxu0 %v854_v36 }
  0x6e   : > { %857 = vmatpush1.bf16.msra.mxu0 %v856_v41 }
  0x6f   : > { %859 = vmatprep.subr.bf16.mxu0 %v858_v42 }
  0x72   : > { %861 = vmatpush1.bf16.msra.mxu0 %v860_v47 }
  0x73   : > { %863 = vmatprep.subr.bf16.mxu0 %v862_v48 }
  0x76   : > { %865 = vmatpush1.bf16.msra.mxu0 %v864_v53 }
  0x77   : > { %867 = vmatprep.subr.bf16.mxu0 %v866_v54 }
  0x7a   : > { %869 = vmatpush1.bf16.msra.mxu0 %v868_v57 }
  0x7d   : > { %450 = vmatmul.mubr.f32.vlgmr.msra.gmra.mrb[0].mxu0 %v337_v58 }
  0xc9   : > { %v497_v11 = vpop.permute.xlu1 %496 }
  0xcd   : > { %v514_v15 = vpop.permute.xlu1 %513 }
  0xdc   : > { %v379_v59 = vpop.permute.xlu0 %378 }
  0xe0   : > { %v579_v12 = vpop.permute.xlu0 %578 }
  0xe4   : > { %v527_v16 = vpop.permute.xlu0 %526 }
 0x150   : > { %v451_v60 = vpop.f32.mrb[0].mxu0 }
 0x151   : > { %v452_v61 = vadd.f32 %v451_v60, %v379_v59  ;;  %v453_v62 = vpop.f32.mrb[1].mxu0 }
 0x152   : > { %v454_v63 = vadd.f32 %v453_v62, %v379_v59 }
 0x153   : > { %v1386_v0 = vmax.f32 %v452_v61, 0.0 }
 0x154   : > { %v1388_v2 = vmax.f32 %v454_v63, 0.0 }
 0x156   : > { %v974_v3 = vpack.i.bf16 %v1388_v2, %v1386_v0  ;;  %v989_v4 = vpack.i.bf16 %v1142_v1, %v1388_v2 }
 0x158   : > { %975 = vrot.lane.b32.xlu1 %v974_v3, %s1144_s28  ;;  %970 = vrot.lane.b32.xlu0 %v974_v3, %s1143_s8  ;;  %s302_s8 = scalar_lea.vmem %s1538_s0, %s832_s20 }
 0x159   : > { %v1407_v5 = vld [vmem:[%s302_s8] sm:$0xff] }
 0x15a   : > { %v305_v6 = vcombine.high %v1407_v5, %v1407_v5  ;;  %v308_v7 = vsel %vm307_vm1, %v1407_v5, 0.0 }
 0x15c   : > { %980 = vrot.lane.b32.xlu1 %v974_v3, %s1145_s7  ;;  %985 = vrot.lane.b32.xlu0 %v974_v3, %s1146_s14  ;;  %s810_s14 = sshll.u32 %s1325_s19, 3 }
 0x160   : > { %552 = vrot.lane.b32.xlu1 %v1386_v0, %s1147_s29  ;;  %539 = vrot.lane.b32.xlu0 %v1386_v0, %s1148_s12 }
 0x164   : > { %990 = vrot.lane.b32.xlu1 %v989_v4, %s1148_s12  ;;  %1000 = vrot.lane.b32.xlu0 %v989_v4, %s1149_s13  ;;  %s297_s12 = scalar_lea.vmem [#allocation7], %s810_s14 }
 0x168   : > { %995 = vrot.lane.b32.xlu1 %v989_v4, %s1147_s29  ;;  %588 = vrot.lane.b32.xlu0 %v1386_v0, %s1149_s13  ;;  %s833_s29 = sshll.u32 %s1210_s25, 7  ;;  %s711_s13 = sshll.u32 %s297_s12, 4  ;;  %s1496_s13 = int_to_ptr.vmem [resolvable:$true] %s711_s13 }
 0x169   : > { %s1494_s20 = scalar_lea.hbm %s1544_s6, %s833_s29  ;;  %s1065_s15 = scalar_lea.vmem %s1496_s13, 128 }
 0x16a   : > { %p1066_p10 = scmp.ne.s32.totalorder %s1496_s13, %s1065_s15  ;;  %s1153_s25 = smov [#allocation7]  }
 0x16b   : > { %s1069_s8 = sshll.u32 %s1153_s25, 4  ;;  %s1070_s8 = int_to_ptr.vmem [resolvable:$false] %s1069_s8 }
 0x16c   : > { %567 = vrot.lane.b32.xlu1 %v1388_v2, %s1150_s18  ;;  %569 = vrot.lane.b32.xlu0 %v1142_v1, %s1150_s18  ;;  %v309_v1 = vsel %vm307_vm1, %v305_v6, 0.0  ;;  %p1067_p4 = pnand %p1066_p10, %p1575_p2  ;;  %s1071_s11 = scalar_lea.vmem %s1070_s8, 256 }
 0x16d   : > { %v310_v8 = vadd.f32 %v309_v1, %v308_v7  ;;  %p1072_p0 = scmp.lt.s32.totalorder %s1496_s13, %s1070_s8  ;;  %p1073_p6 = scmp.lt.s32.totalorder %s1071_s11, %s1065_s15 }
 0x16e   : > { %p1068_p5 = pneg %p1067_p4 }
 0x16f   : > { %p1074_p13 = por %p1073_p6, %p1072_p0 }
 0x170   : > { %565 = vrot.lane.b32.xlu1 %v1386_v0, %s1150_s18 }
 0x171   : > { %p1075_p7 = pnand %p1074_p13, %p1068_p5 }
 0x18b   : > { %311 = vadd.xlane.f32.xlu0 %v310_v8 }
 0x1a1   : > { %603 = vperm.xlu0 %968, %v600_v9  }
 0x1ca   : > { %v976_v19 = vpop.permute.xlu1 %975  ;;  %v971_v20 = vpop.permute.xlu0 %970 }
 0x1cb   : > { %v978_v23 = vunpack.i.h.bf16 %v976_v19  ;;  %v977_v24 = vunpack.i.l.bf16 %v976_v19  ;;  %v973_v25 = vunpack.i.h.bf16 %v971_v20  ;;  %v972_v26 = vunpack.i.l.bf16 %v971_v20 }
 0x1cd   : > { %v504_v27 = vsel %vm502_vm3, %v972_v26, %v973_v25  ;;  %v585_v28 = vsel %vm381_vm0, %v977_v24, %v978_v23  ;;  %v503_v30 = vsel %vm502_vm3, %v497_v11, %v972_v26  ;;  %v584_v31 = vsel %vm381_vm0, %v579_v12, %v977_v24  ;;  %vm886_vm3 = vmpackc.low %vm1446_vm11, %vm1151_vm7 }
 0x1ce   : > { %v981_v32 = vpop.permute.xlu1 %980  ;;  %v986_v33 = vpop.permute.xlu0 %985  ;;  %v870_v35 = vpack.c.bf16 %v585_v28, %v504_v27  ;;  %v873_v36 = vpack.c.bf16 %v584_v31, %v503_v30  ;;  %vm558_vm0 = vcmask 924672  }
 0x1cf   : > { %v983_v39 = vunpack.i.h.bf16 %v981_v32  ;;  %v982_v40 = vunpack.i.l.bf16 %v981_v32  ;;  %v988_v41 = vunpack.i.h.bf16 %v986_v33  ;;  %v987_v42 = vunpack.i.l.bf16 %v986_v33 }
 0x1d0   : > { %872 = vmatprep.subr.msk.bf16.mxu1 %vm1430_vm8, %v870_v35 }
 0x1d1   : > { %v520_v43 = vsel %vm519_vm5, %v514_v15, %v982_v40  ;;  %v521_v44 = vsel %vm519_vm5, %v982_v40, %v983_v39  ;;  %v533_v45 = vsel %vm532_vm6, %v527_v16, %v987_v42  ;;  %v534_v46 = vsel %vm532_vm6, %v987_v42, %v988_v41  ;;  %875 = vmatpush1.bf16.msk.msra.mxu1 %vm1442_vm10, %v873_v36 }
 0x1d2   : > { %v876_v47 = vpack.c.bf16 %v534_v46, %v521_v44  ;;  %v879_v48 = vpack.c.bf16 %v533_v45, %v520_v43  ;;  %v553_v49 = vpop.permute.xlu1 %552  ;;  %v540_v50 = vpop.permute.xlu0 %539  ;;  %vm606_vm5 = vcmask 588800   ;;  %v1152_v15 = vmov 839922192  }
 0x1d3   : > { %v317_v16 = vunpack.c.l.s4 %v1152_v15 }
 0x1d4   : > { %878 = vmatprep.subr.msk.bf16.mxu1 %vm877_vm12, %v876_v47 }
 0x1d5   : > { %881 = vmatpush1.bf16.msk.msra.mxu1 %vm880_vm13, %v879_v48  ;;  %v318_v17 = vunpack.c.0.s8 %v317_v16 }
 0x1d6   : > { %v991_v51 = vpop.permute.xlu1 %990  ;;  %v1001_v52 = vpop.permute.xlu0 %1000 }
 0x1d7   : > { %v993_v53 = vunpack.i.h.bf16 %v991_v51  ;;  %v992_v54 = vunpack.i.l.bf16 %v991_v51  ;;  %v1003_v57 = vunpack.i.h.bf16 %v1001_v52  ;;  %v1002_v58 = vunpack.i.l.bf16 %v1001_v52 }
 0x1d8   : > { %v321_v19 = vsub.s32 %v318_v17, %v320_v18 }
 0x1d9   : > { %v546_v55 = vsel %vm545_vm14, %v540_v50, %v992_v54  ;;  %v547_v56 = vsel %vm545_vm14, %v992_v54, %v993_v53  ;;  %v596_v1 = vsel %vm594_vm2, %v1002_v58, %v1003_v57 }
 0x1da   : > { %v882_v59 = vpack.c.bf16 %v547_v56, %v1388_v2  ;;  %v885_v60 = vpack.c.bf16 %v546_v55, %v1386_v0  ;;  %v996_v61 = vpop.permute.xlu1 %995  ;;  %v589_v62 = vpop.permute.xlu0 %588 }
 0x1db   : > { %v998_v63 = vunpack.i.h.bf16 %v996_v61  ;;  %v997_v3 = vunpack.i.l.bf16 %v996_v61  ;;  %v595_v7 = vsel %vm594_vm2, %v589_v62, %v1002_v58 }
 0x1dc   : > { %884 = vmatprep.subr.msk.bf16.mxu1 %vm883_vm15, %v882_v59 }
 0x1dd   : > { %v559_v4 = vsel %vm558_vm0, %v553_v49, %v997_v3  ;;  %v560_v6 = vsel %vm558_vm0, %v997_v3, %v998_v63  ;;  %887 = vmatpush1.bf16.msk.msra.mxu1 %vm886_vm3, %v885_v60 }
 0x1de   : > { %v888_v8 = vpack.c.bf16 %v596_v1, %v560_v6  ;;  %v891_v2 = vpack.c.bf16 %v595_v7, %v559_v4  ;;  %v568_v9 = vpop.permute.xlu1 %567  ;;  %v570_v0 = vpop.permute.xlu0 %569 }
 0x1df   : > { %v573_v11 = vsel %vm571_vm4, %v568_v9, %v570_v0 }
 0x1e0   : > { %890 = vmatprep.subr.msk.bf16.mxu1 %vm1430_vm8, %v888_v8 }
 0x1e1   : > { %893 = vmatpush1.bf16.msk.msra.mxu1 %vm1442_vm10, %v891_v2 }
 0x1e2   : > { %v566_v12 = vpop.permute.xlu1 %565  ;;  %824 = vmatprep.subr.msk.mxu1 %vm1435_vm9, %v573_v11 }
 0x1e3   : > { %v572_v13 = vsel %vm571_vm4, %v566_v12, %v568_v9 }
 0x1e5   : > { %825 = vmatpush1.msk.msra.mxu1 %vm1446_vm11, %v572_v13 }
 0x1e6   : > { %826 = vmatmul.mubr.msk.f32.vlgmr.msra.gmra.mrb[0].mxu1 %vm606_vm5, %v599_v14 }
 0x218   : > { %v312_v20 = vpop.xlane.xlu0 %311 }
 0x219   : > { %v314_v21 = vmul.f32 0.00390625, %v312_v20 }
 0x21b   : > { %v322_v22 = vrot.slane %v314_v21, %v321_v19 }
 0x21d   : > { %v324_v23 = vsub.f32 %v1407_v5, %v322_v22 }
 0x21f   : > { %v325_v24 = vmul.f32 %v324_v23, %v324_v23 }
 0x220   : > { %v604_v10 = vpop.permute.xlu0 %603 }
 0x221   : > { %v327_v25 = vcombine.high %v325_v24, %v325_v24  ;;  %v329_v26 = vsel %vm307_vm1, %v325_v24, 0.0 }
 0x223   : > { %v330_v27 = vsel %vm307_vm1, %v327_v25, 0.0 }
 0x224   : > { %v331_v28 = vadd.f32 %v330_v27, %v329_v26 }
 0x226   : > { %332 = vadd.xlane.f32.xlu1 %v331_v28 }
 0x2b3   : > { %v333_v29 = vpop.xlane.xlu1 %332 }
 0x2b4   : > { %v334_v30 = vmul.f32 0.00390625, %v333_v29 }
 0x2b6   : > { %v335_v31 = vadd.f32 1e-05, %v334_v30 }
 0x2b8   : > { %1005 = vrsqrt.f32 %v335_v31 }
 0x2b9   : > { %v676_v32 = vpop.f32.mrb[0].mxu1 }
 0x2ba   : > { %v677_v33 = vadd.f32 %v676_v32, %v604_v10  ;;  %v678_v34 = vpop.f32.mrb[1].mxu1 }
 0x2bb   : > { %v679_v35 = vadd.f32 %v678_v34, %v604_v10 }
 0x2bc   : > { %v681_v36 = vadd.f32 1.0, %v677_v33 }
 0x2bd   : > { %v692_v5 = vcombine.high %v677_v33, %v679_v35  ;;  %v682_v37 = vadd.f32 1.0, %v679_v35 }
 0x2c2   : > { %v1006_v38 = vpop.eup %1005 }
 0x2c3   : > { %v683_v39 = vmul.f32 %v1006_v38, %v681_v36  ;;  %v684_v40 = vmul.f32 %v1006_v38, %v682_v37 }
 0x2c5   : > { %v687_v41 = vcombine.low %v683_v39, %v684_v40 }
 0x2c7   : > { %v689_v42 = vmul.f32 %v687_v41, %v324_v23 }
 0x2c9   : > { %v694_v43 = vadd.f32 %v692_v5, %v689_v42 }
 0x2cb   : > { %695 = vst [vmem:[%s297_s12] sm:$0xff] %v694_v43 }
 0x2cc   : > { %1078 = shalt.err (!%p1075_p7)
}
 0x2cd   : > { %s1079_s19 = scalar_lea.hbm %s1494_s20, 128  ;;  %s1083_s7 = scalar_lea.hbm %s1544_s6, 256 }
 0x2ce   : > { %p1080_p3 = scmp.ne.s32.totalorder %s1494_s20, %s1079_s19  ;;  %p1084_p11 = scmp.lt.u32.totalorder %s1494_s20, %s1544_s6 }
 0x2cf   : > { %p1085_p8 = scmp.lt.u32.totalorder %s1083_s7, %s1079_s19  ;;  %p1087_p10 = scmp.lt.u32.totalorder %s1079_s19, %s1494_s20 }
 0x2d0   : > { %p1081_p12 = pnand %p1080_p3, %p1575_p2 }
 0x2d1   : > { %p1086_p9 = por %p1085_p8, %p1084_p11 }
 0x2d2   : > { %p1082_p1 = pneg %p1081_p12 }
 0x2d3   : > { %p1088_p4 = por %p1087_p10, %p1086_p9 }
 0x2d5   : > { %p1089_p5 = pnand %p1088_p4, %p1082_p1 }
 0x2d7   : > { %1092 = shalt.err (!%p1089_p5)
}
 0x2d8   : > { %903 = dma.vmem_to_hbm [thread:$0]  (%p1575_p2), %s1496_s13, 128, %s1494_s20, %s697_s26  }
 0x2d9 PF: > { %s723_s12 = sand.u32 1, %s1123_s21   ;;  %p1576_p0 = scmp.ne.s32.totalorder %s1553_s10, 0 }
 0x2da   : > { %p1577_p6 = scmp.ge.s32.totalorder %s1135_s24, 2  ;;  %s724_s18 = scalar_lea.sflag [#allocation4], %s723_s12 }
 0x2dc   : > { %p914_p13 = pnand %p1577_p6, %p1576_p0 }
 0x2de   : > { %1118 = dma.done.wait (!%p914_p13), %s724_s18, 128  }
 0x2df   : > { %1120 = vsyncadd (!%p914_p13), %s724_s18, 4294967168  ;;  %p20_p7 = scmp.ge.s32.totalorder %s1214_s27, 4   ;;  %s1578_s21 = smov %s1127_s22 }
 0x2e0   : > { %s1579_s22 = smov %s1131_s23  ;;  %s1580_s23 = smov %s1226_s30 }
 0x2e1   : > { %s1581_s24 = smov %s1214_s27  ;;  %22 = sbr.rel (!%p20_p7) target bundleno = 6 (0x6), region = 96 }
 0x2e8   :  { %729 = vsyncpa [#allocation3], 1 }
 0x2e9   :  { %731 = vsyncpa [#allocation3 + $0x1], 1 }
 0x2ea   :  { %732 = vsyncpa [#allocation6], 1 }
 0x2eb   :  { %733 = vsyncpa [#allocation4], 1 }
 0x2ec   :  { %735 = vsyncpa [#allocation4 + $0x1], 1 }

</bundles_post_ra>
